<compile_context>
chip_gen: v5e
topology: v5e:2x2
jax: 0.10.0
libtpu: 0.0.40
codegen_flags: <defaults>
</compile_context>

<pallas_src>
import jax
import jax.numpy as jnp
from jax.experimental import pallas as pl
from jax.experimental.pallas import tpu as pltpu

DEFAULT_CLIP_DATA_VALUE = 27.6041  # hyperfast default clip value


def _round_up(n, m):
    return ((n + m - 1) // m) * m


def _pad_to(a, axis, target):
    """Zero-pad `a` along `axis` up to exactly `target`."""
    size = a.shape[axis]
    if size == target:
        return a
    widths = [(0, 0)] * a.ndim
    widths[axis] = (0, target - size)
    return jnp.pad(a, widths)


def _make_kernel(n_layers: int):
    """Kernel body for a fixed number of main-network layers.

    Args layout: (x, rfw_t_blk, comp_t_blk, pca_bias, [w_i, b_i]*n, out, acc).
    Grid: (batch_tiles, R_blocks); axis 1 is the streamed reduction.
    """

    def kernel(x_ref, rfw_t_ref, comp_t_ref, pca_b_ref, *rest):
        layer_refs = rest[: 2 * n_layers]
        out_ref = rest[2 * n_layers]
        acc_ref = rest[2 * n_layers + 1]

        k = pl.program_id(1)

        @pl.when(k == 0)
        def _init():
            acc_ref[...] = jnp.zeros_like(acc_ref)

        # Fused RandomFeatures + ReLU + partial PCA contraction for this
        # R-block.  The D contraction is complete per block, so the ReLU is
        # exact; accumulation over R-blocks reconstructs the full PCA matmul.
        rf = jnp.dot(x_ref[...], rfw_t_ref[...],
                     preferred_element_type=jnp.float32)
        rf = jnp.maximum(rf, 0.0)
        acc_ref[...] += jnp.dot(rf.astype(comp_t_ref.dtype), comp_t_ref[...],
                                preferred_element_type=jnp.float32)

        @pl.when(k == pl.num_programs(1) - 1)
        def _finalize():
            # PCA mean folded into an affine bias on the host:
            #   (h - mean) @ C.T == h @ C.T + (-(mean @ C.T))
            h = acc_ref[...] + pca_b_ref[...]
            h = jnp.clip(h, -DEFAULT_CLIP_DATA_VALUE, DEFAULT_CLIP_DATA_VALUE)

            residual = h
            for n in range(n_layers):
                w_ref = layer_refs[2 * n]          # (in_p, out_p), h @ w
                b = layer_refs[2 * n + 1][...]     # (1, out_p), f32
                if n % 2 == 0:
                    residual = h
                h = jnp.dot(h.astype(w_ref.dtype), w_ref[...],
                            preferred_element_type=jnp.float32) + b
                if n % 2 == 1 and n < n_layers - 1:
                    h = h + residual
                if n < n_layers - 1:
                    h = jnp.maximum(h, 0.0)

            out_ref[...] = h.astype(out_ref.dtype)

    return kernel


def main_network_forward(x, rf_weight, pca_mean, pca_components, layer_params,
                         *, batch_tile=256, rk_tile_max=512,
                         matmul_dtype=jnp.bfloat16, lane_multiple=128):
    """Pallas-backed forward of MainNetwork.

    x:              (B, D) float32
    rf_weight:      (R, D) float32        (nn.Linear weight, no bias)
    pca_mean:       (R,)   float32
    pca_components: (C, R) float32        (sklearn-style components_)
    layer_params:   list of (matrix (in, out), bias (out,)) tuples
    matmul_dtype:   operand dtype for matmuls (accumulation stays f32).
    """
    f32 = jnp.float32
    B, D = x.shape
    R = rf_weight.shape[0]
    C = pca_components.shape[0]
    n_layers = len(layer_params)
    n_out = layer_params[-1][0].shape[1]

    # ---- padded (lane-dense) sizes ------------------------------------------
    Dp = _round_up(D, lane_multiple)
    Rp = _round_up(R, lane_multiple)
    Cp = _round_up(C, lane_multiple)

    # R-block tile: largest multiple of 128 <= rk_tile_max that divides Rp.
    rk_tile = lane_multiple
    for cand in range(min(Rp, rk_tile_max), 0, -lane_multiple):
        if Rp % cand == 0:
            rk_tile = cand
            break
    n_k = Rp // rk_tile

    # Batch tile: big tiles for big batches; tiny batches only pad to 8 rows.
    if B >= batch_tile:
        tb = batch_tile
    else:
        tb = max(8, _round_up(B, 8))
    Bp = _round_up(B, tb)
    n_b = Bp // tb

    # ---- one-time host-side parameter prep (grid-invariant) -----------------
    rf_w_t = jnp.asarray(rf_weight, f32).T                      # (D, R)
    rf_w_t = _pad_to(_pad_to(rf_w_t, 0, Dp), 1, Rp)             # (Dp, Rp)
    comp = jnp.asarray(pca_components, f32)                     # (C, R)
    comp_t = _pad_to(_pad_to(comp.T, 0, Rp), 1, Cp)             # (Rp, Cp)
    pca_bias = (-(jnp.asarray(pca_mean, f32) @ comp.T)).reshape(1, -1)
    pca_bias = _pad_to(pca_bias, 1, Cp)                         # (1, Cp) f32

    mats, biases = [], []
    for (w, b) in layer_params:
        w = jnp.asarray(w, f32)
        in_p = _round_up(w.shape[0], lane_multiple)
        out_p = _round_up(w.shape[1], lane_multiple)
        mats.append(_pad_to(_pad_to(w, 0, in_p), 1, out_p))
        biases.append(_pad_to(jnp.asarray(b, f32).reshape(1, -1), 1, out_p))
    n_out_p = mats[-1].shape[1]

    x_p = _pad_to(_pad_to(jnp.asarray(x, f32), 1, Dp), 0, Bp)

    # Matmul-operand dtype (bf16 default); biases and all post-dot math stay f32.
    x_p = x_p.astype(matmul_dtype)
    rf_w_t = rf_w_t.astype(matmul_dtype)
    comp_t = comp_t.astype(matmul_dtype)
    mats = [m.astype(matmul_dtype) for m in mats]

    const_params = [pca_bias]
    for m, b in zip(mats, biases):
        const_params += [m, b]

    kernel = _make_kernel(n_layers)

    # ---- compiler hints ------------------------------------------------------
    itemsize = jnp.dtype(matmul_dtype).itemsize
    const_param_bytes = sum(int(p.size) * p.dtype.itemsize for p in const_params)
    streamed_blk_bytes = (Dp * rk_tile + rk_tile * Cp) * itemsize
    tile_bytes = tb * Dp * itemsize + tb * n_out_p * 4
    acc_bytes = tb * Cp * 4
    widest = max([Cp] + [m.shape[1] for m in mats])
    headroom = 8 * tb * widest * 4                      # finalize-step temporaries

    try:
        info = pltpu.get_tpu_info()
        vmem_cap = int(getattr(info, "vmem_capacity_bytes", 128 * 1024 * 1024))
    except Exception:
        vmem_cap = 128 * 1024 * 1024
    # v7x (64 MiB/TC): leave >=16 MiB headroom. v5e/v6e (128 MiB): up to ~100 MiB.
    vmem_budget = min(max(vmem_cap - 16 * 1024 * 1024, vmem_cap // 2),
                      100 * 1024 * 1024)

    flops = 2 * Bp * (Dp * Rp + Rp * Cp
                      + sum(m.shape[0] * m.shape[1] for m in mats))
    bytes_accessed = (Bp * Dp * itemsize
                      + n_b * (int(rf_w_t.size) + int(comp_t.size)) * itemsize
                      + const_param_bytes + Bp * n_out_p * 4)
    cost = pl.CostEstimate(flops=int(flops), transcendentals=0,
                           bytes_accessed=int(bytes_accessed))

    def build_and_run(single_buffer_consts: bool):
        param_buf = 1 if single_buffer_consts else 2
        needed = (2 * (tile_bytes + streamed_blk_bytes)
                  + param_buf * const_param_bytes + acc_bytes + headroom)
        vmem_limit = int(min(max(needed, 4 * 1024 * 1024), vmem_budget))

        in_specs = [
            # x tile: constant across the k axis -> fetched once per batch tile.
            pl.BlockSpec((tb, Dp), lambda i, k: (i, 0)),
            # Streamed weight blocks (double-buffered by default).
            pl.BlockSpec((Dp, rk_tile), lambda i, k: (0, k)),
            pl.BlockSpec((rk_tile, Cp), lambda i, k: (k, 0)),
        ]
        for p in const_params:
            if single_buffer_consts:
                # Grid-invariant: no need to double-buffer.
                in_specs.append(pl.BlockSpec(p.shape, lambda i, k: (0, 0),
                                             pipeline_mode=pl.Buffered(1)))
            else:
                in_specs.append(pl.BlockSpec(p.shape, lambda i, k: (0, 0)))
        out_specs = pl.BlockSpec((tb, n_out_p), lambda i, k: (i, 0))

        out = pl.pallas_call(
            kernel,
            out_shape=jax.ShapeDtypeStruct((Bp, n_out_p), jnp.float32),
            grid=(n_b, n_k),
            in_specs=in_specs,
            out_specs=out_specs,
            scratch_shapes=[pltpu.VMEM((tb, Cp), jnp.float32)],
            compiler_params=pltpu.CompilerParams(
                dimension_semantics=("parallel", "arbitrary"),
                vmem_limit_bytes=vmem_limit,
            ),
            cost_estimate=cost,
        )(x_p, rf_w_t, comp_t, *const_params)
        return jax.block_until_ready(out)

    try:
        out = build_and_run(True)
    except Exception:
        # Fallback if pipeline_mode=pl.Buffered(1) is rejected by this jax build.
        out = build_and_run(False)

    # Slice off batch and output-lane zero-padding.
    return out[:B, :n_out]


def main_network_reference(x, rf_weight, pca_mean, pca_components, layer_params):
    """Pure-JAX reference mirroring the PyTorch forward, for validation."""
    h = jnp.maximum(x @ rf_weight.T, 0.0)
    h = h - pca_mean
    h = h @ pca_components.T
    h = jnp.clip(h, -DEFAULT_CLIP_DATA_VALUE, DEFAULT_CLIP_DATA_VALUE)
    n_layers = len(layer_params)
    residual = h
    for n, (w, b) in enumerate(layer_params):
        if n % 2 == 0:
            residual = h
        h = h @ w + b
        if n % 2 == 1 and n < n_layers - 1:
            h = h + residual
        if n < n_layers - 1:
            h = jnp.maximum(h, 0.0)
    return h


if __name__ == "__main__":
    # Small shapes consistent with the module's forward:
    #   batch=16, n_features=32, rf_dim=64, n_components=32,
    #   main network: 32 -> 64 -> 32 -> 8  (3 layers => one residual add).
    B, D, R, C, H, NCLS = 16, 32, 64, 32, 64, 8

    key = jax.random.PRNGKey(0)
    keys = jax.random.split(key, 10)

    x = jax.random.normal(keys[0], (B, D), dtype=jnp.float32)

    # RandomFeatures net: linear (no bias) + ReLU.
    rf_weight = jax.random.normal(keys[1], (R, D), dtype=jnp.float32) * 0.3

    # PCA parameters.
    pca_mean = jax.random.normal(keys[2], (R,), dtype=jnp.float32) * 0.1
    pca_components = jax.random.normal(keys[3], (C, R), dtype=jnp.float32) * 0.2

    # main_network_weights: list of (matrix (in, out), bias (out,)).
    layer_params = [
        (jax.random.normal(keys[4], (C, H), dtype=jnp.float32) * 0.2,
         jax.random.normal(keys[5], (H,), dtype=jnp.float32) * 0.05),
        (jax.random.normal(keys[6], (H, C), dtype=jnp.float32) * 0.2,
         jax.random.normal(keys[7], (C,), dtype=jnp.float32) * 0.05),
        (jax.random.normal(keys[8], (C, NCLS), dtype=jnp.float32) * 0.2,
         jax.random.normal(keys[9], (NCLS,), dtype=jnp.float32) * 0.05),
    ]

    ref = main_network_reference(x, rf_weight, pca_mean, pca_components,
                                 layer_params)

    # f32 matmul path (tight match vs reference up to f32 rounding / folding).
    out_f32 = main_network_forward(x, rf_weight, pca_mean, pca_components,
                                   layer_params, matmul_dtype=jnp.float32)
    out_f32 = jax.block_until_ready(out_f32)
    assert out_f32.shape == (B, NCLS)
    assert jnp.allclose(out_f32, ref, atol=2e-3, rtol=2e-3), \
        "f32 Pallas kernel mismatch"

    # bf16 matmul path (default, v6e/v7x fast MXU path); loose tolerance.
    out_bf16 = main_network_forward(x, rf_weight, pca_mean, pca_components,
                                    layer_params)
    out_bf16 = jax.block_until_ready(out_bf16)
    assert out_bf16.shape == (B, NCLS)
    assert jnp.allclose(out_bf16, ref, atol=0.5, rtol=0.1), \
        "bf16 Pallas kernel mismatch"

    # TODO(synk): intermediate_activations is collected but never returned by
    # the PyTorch module's forward, so it is intentionally not materialized.
    print("KERNEL_OK")
</pallas_src>

<mosaic_0001>
module attributes {stable_mosaic.version = 11 : i64} {
  func.func @kernel(%arg0: i32, %arg1: i32, %arg2: memref<16x128xf32, #tpu.memory_space<vmem>>, %arg3: memref<128x128xf32, #tpu.memory_space<vmem>>, %arg4: memref<128x128xf32, #tpu.memory_space<vmem>>, %arg5: memref<1x128xf32, #tpu.memory_space<vmem>>, %arg6: memref<128x128xf32, #tpu.memory_space<vmem>>, %arg7: memref<1x128xf32, #tpu.memory_space<vmem>>, %arg8: memref<128x128xf32, #tpu.memory_space<vmem>>, %arg9: memref<1x128xf32, #tpu.memory_space<vmem>>, %arg10: memref<128x128xf32, #tpu.memory_space<vmem>>, %arg11: memref<1x128xf32, #tpu.memory_space<vmem>>, %arg12: memref<16x128xf32, #tpu.memory_space<vmem>>, %arg13: memref<16x128xf32, #tpu.memory_space<vmem>>) attributes {dimension_semantics = [#tpu.dimension_semantics<parallel>, #tpu.dimension_semantics<arbitrary>], iteration_bounds = array<i64: 1, 1>, scalar_prefetch = 0 : i64, scratch_operands = 1 : i64, tpu.core_type = #tpu.core_type<tc>, window_params = [{transform_indices = @transform_0, window_bounds = array<i64: 16, 128>}, {transform_indices = @transform_1, window_bounds = array<i64: 128, 128>}, {transform_indices = @transform_2, window_bounds = array<i64: 128, 128>}, {pipeline_mode = #tpu.pipeline_mode<synchronous>, transform_indices = @transform_3, window_bounds = array<i64: 1, 128>}, {pipeline_mode = #tpu.pipeline_mode<synchronous>, transform_indices = @transform_4, window_bounds = array<i64: 128, 128>}, {pipeline_mode = #tpu.pipeline_mode<synchronous>, transform_indices = @transform_5, window_bounds = array<i64: 1, 128>}, {pipeline_mode = #tpu.pipeline_mode<synchronous>, transform_indices = @transform_6, window_bounds = array<i64: 128, 128>}, {pipeline_mode = #tpu.pipeline_mode<synchronous>, transform_indices = @transform_7, window_bounds = array<i64: 1, 128>}, {pipeline_mode = #tpu.pipeline_mode<synchronous>, transform_indices = @transform_8, window_bounds = array<i64: 128, 128>}, {pipeline_mode = #tpu.pipeline_mode<synchronous>, transform_indices = @transform_9, window_bounds = array<i64: 1, 128>}, {transform_indices = @transform_10, window_bounds = array<i64: 16, 128>}]} {
    %c0_i32 = arith.constant 0 : i32
    %0 = arith.cmpi eq, %arg1, %c0_i32 : i32
    %1 = arith.extui %0 : i1 to i32
    %c0_i32_0 = arith.constant 0 : i32
    %2 = arith.cmpi ne, %1, %c0_i32_0 : i32
    scf.if %2 {
      %cst_14 = arith.constant 0.000000e+00 : f32
      %16 = vector.broadcast %cst_14 : f32 to vector<16x128xf32>
      %c0_15 = arith.constant 0 : index
      %c0_16 = arith.constant 0 : index
      %17 = vector.load %arg13[%c0_15, %c0_16] : memref<16x128xf32, #tpu.memory_space<vmem>>, vector<16x128xf32>
      tpu.vector_store %arg13[%c0_15, %c0_16], %16 {strides = array<i32>} : memref<16x128xf32, #tpu.memory_space<vmem>>, vector<16x128xf32>,
    } else {
    }
    %c0 = arith.constant 0 : index
    %c0_1 = arith.constant 0 : index
    %3 = vector.load %arg2[%c0, %c0_1] : memref<16x128xf32, #tpu.memory_space<vmem>>, vector<16x128xf32>
    %c0_2 = arith.constant 0 : index
    %c0_3 = arith.constant 0 : index
    %4 = vector.load %arg3[%c0_2, %c0_3] : memref<128x128xf32, #tpu.memory_space<vmem>>, vector<128x128xf32>
    %cst = arith.constant dense<0.000000e+00> : vector<16x128xf32>
    %5 = tpu.matmul %3, %4, %cst {dimension_numbers = #tpu.dot_dimension_numbers<[1], [0], [0], [1], [0, 0, 1, 1], [], []>} : vector<16x128xf32>, vector<128x128xf32>, vector<16x128xf32> -> vector<16x128xf32>
    %cst_4 = arith.constant 0.000000e+00 : f32
    %6 = vector.broadcast %cst_4 : f32 to vector<16x128xf32>
    %7 = arith.maximumf %5, %6 : vector<16x128xf32>
    %c0_5 = arith.constant 0 : index
    %c0_6 = arith.constant 0 : index
    %8 = vector.load %arg13[%c0_5, %c0_6] : memref<16x128xf32, #tpu.memory_space<vmem>>, vector<16x128xf32>
    %c0_7 = arith.constant 0 : index
    %c0_8 = arith.constant 0 : index
    %9 = vector.load %arg4[%c0_7, %c0_8] : memref<128x128xf32, #tpu.memory_space<vmem>>, vector<128x128xf32>
    %cst_9 = arith.constant dense<0.000000e+00> : vector<16x128xf32>
    %10 = tpu.matmul %7, %9, %cst_9 {dimension_numbers = #tpu.dot_dimension_numbers<[1], [0], [0], [1], [0, 0, 1, 1], [], []>} : vector<16x128xf32>, vector<128x128xf32>, vector<16x128xf32> -> vector<16x128xf32>
    %11 = arith.addf %8, %10 : vector<16x128xf32>
    %c0_10 = arith.constant 0 : index
    %c0_11 = arith.constant 0 : index
    %12 = vector.load %arg13[%c0_10, %c0_11] : memref<16x128xf32, #tpu.memory_space<vmem>>, vector<16x128xf32>
    tpu.vector_store %arg13[%c0_10, %c0_11], %11 {strides = array<i32>} : memref<16x128xf32, #tpu.memory_space<vmem>>, vector<16x128xf32>,
    %c0_i32_12 = arith.constant 0 : i32
    %13 = arith.cmpi eq, %arg1, %c0_i32_12 : i32
    %14 = arith.extui %13 : i1 to i32
    %c0_i32_13 = arith.constant 0 : i32
    %15 = arith.cmpi ne, %14, %c0_i32_13 : i32
    scf.if %15 {
      %c0_14 = arith.constant 0 : index
      %c0_15 = arith.constant 0 : index
      %16 = vector.load %arg13[%c0_14, %c0_15] : memref<16x128xf32, #tpu.memory_space<vmem>>, vector<16x128xf32>
      %c0_16 = arith.constant 0 : index
      %c0_17 = arith.constant 0 : index
      %17 = vector.load %arg5[%c0_16, %c0_17] : memref<1x128xf32, #tpu.memory_space<vmem>>, vector<1x128xf32>
      %18 = vector.broadcast %17 : vector<1x128xf32> to vector<16x128xf32>
      %19 = arith.addf %16, %18 : vector<16x128xf32>
      %cst_18 = arith.constant -2.760410e+01 : f32
      %cst_19 = arith.constant 2.760410e+01 : f32
      %20 = vector.broadcast %cst_18 : f32 to vector<16x128xf32>
      %21 = arith.maximumf %20, %19 : vector<16x128xf32>
      %22 = vector.broadcast %cst_19 : f32 to vector<16x128xf32>
      %23 = arith.minimumf %22, %21 : vector<16x128xf32>
      %c0_20 = arith.constant 0 : index
      %c0_21 = arith.constant 0 : index
      %24 = vector.load %arg7[%c0_20, %c0_21] : memref<1x128xf32, #tpu.memory_space<vmem>>, vector<1x128xf32>
      %c0_22 = arith.constant 0 : index
      %c0_23 = arith.constant 0 : index
      %25 = vector.load %arg6[%c0_22, %c0_23] : memref<128x128xf32, #tpu.memory_space<vmem>>, vector<128x128xf32>
      %cst_24 = arith.constant dense<0.000000e+00> : vector<16x128xf32>
      %26 = tpu.matmul %23, %25, %cst_24 {dimension_numbers = #tpu.dot_dimension_numbers<[1], [0], [0], [1], [0, 0, 1, 1], [], []>} : vector<16x128xf32>, vector<128x128xf32>, vector<16x128xf32> -> vector<16x128xf32>
      %27 = vector.broadcast %24 : vector<1x128xf32> to vector<16x128xf32>
      %28 = arith.addf %26, %27 : vector<16x128xf32>
      %cst_25 = arith.constant 0.000000e+00 : f32
      %29 = vector.broadcast %cst_25 : f32 to vector<16x128xf32>
      %30 = arith.maximumf %28, %29 : vector<16x128xf32>
      %c0_26 = arith.constant 0 : index
      %c0_27 = arith.constant 0 : index
      %31 = vector.load %arg9[%c0_26, %c0_27] : memref<1x128xf32, #tpu.memory_space<vmem>>, vector<1x128xf32>
      %c0_28 = arith.constant 0 : index
      %c0_29 = arith.constant 0 : index
      %32 = vector.load %arg8[%c0_28, %c0_29] : memref<128x128xf32, #tpu.memory_space<vmem>>, vector<128x128xf32>
      %cst_30 = arith.constant dense<0.000000e+00> : vector<16x128xf32>
      %33 = tpu.matmul %30, %32, %cst_30 {dimension_numbers = #tpu.dot_dimension_numbers<[1], [0], [0], [1], [0, 0, 1, 1], [], []>} : vector<16x128xf32>, vector<128x128xf32>, vector<16x128xf32> -> vector<16x128xf32>
      %34 = vector.broadcast %31 : vector<1x128xf32> to vector<16x128xf32>
      %35 = arith.addf %33, %34 : vector<16x128xf32>
      %36 = arith.addf %35, %23 : vector<16x128xf32>
      %cst_31 = arith.constant 0.000000e+00 : f32
      %37 = vector.broadcast %cst_31 : f32 to vector<16x128xf32>
      %38 = arith.maximumf %36, %37 : vector<16x128xf32>
      %c0_32 = arith.constant 0 : index
      %c0_33 = arith.constant 0 : index
      %39 = vector.load %arg11[%c0_32, %c0_33] : memref<1x128xf32, #tpu.memory_space<vmem>>, vector<1x128xf32>
      %c0_34 = arith.constant 0 : index
      %c0_35 = arith.constant 0 : index
      %40 = vector.load %arg10[%c0_34, %c0_35] : memref<128x128xf32, #tpu.memory_space<vmem>>, vector<128x128xf32>
      %cst_36 = arith.constant dense<0.000000e+00> : vector<16x128xf32>
      %41 = tpu.matmul %38, %40, %cst_36 {dimension_numbers = #tpu.dot_dimension_numbers<[1], [0], [0], [1], [0, 0, 1, 1], [], []>} : vector<16x128xf32>, vector<128x128xf32>, vector<16x128xf32> -> vector<16x128xf32>
      %42 = vector.broadcast %39 : vector<1x128xf32> to vector<16x128xf32>
      %43 = arith.addf %41, %42 : vector<16x128xf32>
      %c0_37 = arith.constant 0 : index
      %c0_38 = arith.constant 0 : index
      %44 = vector.load %arg12[%c0_37, %c0_38] : memref<16x128xf32, #tpu.memory_space<vmem>>, vector<16x128xf32>
      tpu.vector_store %arg12[%c0_37, %c0_38], %43 {strides = array<i32>} : memref<16x128xf32, #tpu.memory_space<vmem>>, vector<16x128xf32>,
    } else {
    }
    return
  }
  func.func @transform_0(%arg0: i32, %arg1: i32) -> (i32, i32) {
    %c0_i32 = arith.constant 0 : i32
    %c0_i32_0 = arith.constant 0 : i32
    return %arg0, %c0_i32 : i32, i32
  }
  func.func @transform_1(%arg0: i32, %arg1: i32) -> (i32, i32) {
    %c0_i32 = arith.constant 0 : i32
    %c0_i32_0 = arith.constant 0 : i32
    return %c0_i32, %arg1 : i32, i32
  }
  func.func @transform_2(%arg0: i32, %arg1: i32) -> (i32, i32) {
    %c0_i32 = arith.constant 0 : i32
    %c0_i32_0 = arith.constant 0 : i32
    return %arg1, %c0_i32 : i32, i32
  }
  func.func @transform_3(%arg0: i32, %arg1: i32) -> (i32, i32) {
    %c0_i32 = arith.constant 0 : i32
    %c0_i32_0 = arith.constant 0 : i32
    %c0_i32_1 = arith.constant 0 : i32
    return %c0_i32, %c0_i32_0 : i32, i32
  }
  func.func @transform_4(%arg0: i32, %arg1: i32) -> (i32, i32) {
    %c0_i32 = arith.constant 0 : i32
    %c0_i32_0 = arith.constant 0 : i32
    %c0_i32_1 = arith.constant 0 : i32
    return %c0_i32, %c0_i32_0 : i32, i32
  }
  func.func @transform_5(%arg0: i32, %arg1: i32) -> (i32, i32) {
    %c0_i32 = arith.constant 0 : i32
    %c0_i32_0 = arith.constant 0 : i32
    %c0_i32_1 = arith.constant 0 : i32
    return %c0_i32, %c0_i32_0 : i32, i32
  }
  func.func @transform_6(%arg0: i32, %arg1: i32) -> (i32, i32) {
    %c0_i32 = arith.constant 0 : i32
    %c0_i32_0 = arith.constant 0 : i32
    %c0_i32_1 = arith.constant 0 : i32
    return %c0_i32, %c0_i32_0 : i32, i32
  }
  func.func @transform_7(%arg0: i32, %arg1: i32) -> (i32, i32) {
    %c0_i32 = arith.constant 0 : i32
    %c0_i32_0 = arith.constant 0 : i32
    %c0_i32_1 = arith.constant 0 : i32
    return %c0_i32, %c0_i32_0 : i32, i32
  }
  func.func @transform_8(%arg0: i32, %arg1: i32) -> (i32, i32) {
    %c0_i32 = arith.constant 0 : i32
    %c0_i32_0 = arith.constant 0 : i32
    %c0_i32_1 = arith.constant 0 : i32
    return %c0_i32, %c0_i32_0 : i32, i32
  }
  func.func @transform_9(%arg0: i32, %arg1: i32) -> (i32, i32) {
    %c0_i32 = arith.constant 0 : i32
    %c0_i32_0 = arith.constant 0 : i32
    %c0_i32_1 = arith.constant 0 : i32
    return %c0_i32, %c0_i32_0 : i32, i32
  }
  func.func @transform_10(%arg0: i32, %arg1: i32) -> (i32, i32) {
    %c0_i32 = arith.constant 0 : i32
    %c0_i32_0 = arith.constant 0 : i32
    return %arg0, %c0_i32 : i32, i32
  }
}

module attributes {stable_mosaic.version = 11 : i64} {
  func.func @kernel(%arg0: i32, %arg1: i32, %arg2: memref<16x128xf32, #tpu.memory_space<vmem>>, %arg3: memref<128x128xf32, #tpu.memory_space<vmem>>, %arg4: memref<128x128xf32, #tpu.memory_space<vmem>>, %arg5: memref<1x128xf32, #tpu.memory_space<vmem>>, %arg6: memref<128x128xf32, #tpu.memory_space<vmem>>, %arg7: memref<1x128xf32, #tpu.memory_space<vmem>>, %arg8: memref<128x128xf32, #tpu.memory_space<vmem>>, %arg9: memref<1x128xf32, #tpu.memory_space<vmem>>, %arg10: memref<128x128xf32, #tpu.memory_space<vmem>>, %arg11: memref<1x128xf32, #tpu.memory_space<vmem>>, %arg12: memref<16x128xf32, #tpu.memory_space<vmem>>, %arg13: memref<16x128xf32, #tpu.memory_space<vmem>>) attributes {dimension_semantics = [#tpu.dimension_semantics<parallel>, #tpu.dimension_semantics<arbitrary>], iteration_bounds = array<i64: 1, 1>, scalar_prefetch = 0 : i64, scratch_operands = 1 : i64, tpu.core_type = #tpu.core_type<tc>, window_params = [{transform_indices = @transform_0, window_bounds = array<i64: 16, 128>}, {transform_indices = @transform_1, window_bounds = array<i64: 128, 128>}, {transform_indices = @transform_2, window_bounds = array<i64: 128, 128>}, {pipeline_mode = #tpu.pipeline_mode<synchronous>, transform_indices = @transform_3, window_bounds = array<i64: 1, 128>}, {pipeline_mode = #tpu.pipeline_mode<synchronous>, transform_indices = @transform_4, window_bounds = array<i64: 128, 128>}, {pipeline_mode = #tpu.pipeline_mode<synchronous>, transform_indices = @transform_5, window_bounds = array<i64: 1, 128>}, {pipeline_mode = #tpu.pipeline_mode<synchronous>, transform_indices = @transform_6, window_bounds = array<i64: 128, 128>}, {pipeline_mode = #tpu.pipeline_mode<synchronous>, transform_indices = @transform_7, window_bounds = array<i64: 1, 128>}, {pipeline_mode = #tpu.pipeline_mode<synchronous>, transform_indices = @transform_8, window_bounds = array<i64: 128, 128>}, {pipeline_mode = #tpu.pipeline_mode<synchronous>, transform_indices = @transform_9, window_bounds = array<i64: 1, 128>}, {transform_indices = @transform_10, window_bounds = array<i64: 16, 128>}]} {
    %c0_i32 = arith.constant 0 : i32
    %0 = arith.cmpi eq, %arg1, %c0_i32 : i32
    %1 = arith.extui %0 : i1 to i32
    %c0_i32_0 = arith.constant 0 : i32
    %2 = arith.cmpi ne, %1, %c0_i32_0 : i32
    scf.if %2 {
      %cst_14 = arith.constant 0.000000e+00 : f32
      %16 = vector.broadcast %cst_14 : f32 to vector<16x128xf32>
      %c0_15 = arith.constant 0 : index
      %c0_16 = arith.constant 0 : index
      %17 = vector.load %arg13[%c0_15, %c0_16] : memref<16x128xf32, #tpu.memory_space<vmem>>, vector<16x128xf32>
      tpu.vector_store %arg13[%c0_15, %c0_16], %16 {strides = array<i32>} : memref<16x128xf32, #tpu.memory_space<vmem>>, vector<16x128xf32>,
    } else {
    }
    %c0 = arith.constant 0 : index
    %c0_1 = arith.constant 0 : index
    %3 = vector.load %arg2[%c0, %c0_1] : memref<16x128xf32, #tpu.memory_space<vmem>>, vector<16x128xf32>
    %c0_2 = arith.constant 0 : index
    %c0_3 = arith.constant 0 : index
    %4 = vector.load %arg3[%c0_2, %c0_3] : memref<128x128xf32, #tpu.memory_space<vmem>>, vector<128x128xf32>
    %cst = arith.constant dense<0.000000e+00> : vector<16x128xf32>
    %5 = tpu.matmul %3, %4, %cst {dimension_numbers = #tpu.dot_dimension_numbers<[1], [0], [0], [1], [0, 0, 1, 1], [], []>} : vector<16x128xf32>, vector<128x128xf32>, vector<16x128xf32> -> vector<16x128xf32>
    %cst_4 = arith.constant 0.000000e+00 : f32
    %6 = vector.broadcast %cst_4 : f32 to vector<16x128xf32>
    %7 = arith.maximumf %5, %6 : vector<16x128xf32>
    %c0_5 = arith.constant 0 : index
    %c0_6 = arith.constant 0 : index
    %8 = vector.load %arg13[%c0_5, %c0_6] : memref<16x128xf32, #tpu.memory_space<vmem>>, vector<16x128xf32>
    %c0_7 = arith.constant 0 : index
    %c0_8 = arith.constant 0 : index
    %9 = vector.load %arg4[%c0_7, %c0_8] : memref<128x128xf32, #tpu.memory_space<vmem>>, vector<128x128xf32>
    %cst_9 = arith.constant dense<0.000000e+00> : vector<16x128xf32>
    %10 = tpu.matmul %7, %9, %cst_9 {dimension_numbers = #tpu.dot_dimension_numbers<[1], [0], [0], [1], [0, 0, 1, 1], [], []>} : vector<16x128xf32>, vector<128x128xf32>, vector<16x128xf32> -> vector<16x128xf32>
    %11 = arith.addf %8, %10 : vector<16x128xf32>
    %c0_10 = arith.constant 0 : index
    %c0_11 = arith.constant 0 : index
    %12 = vector.load %arg13[%c0_10, %c0_11] : memref<16x128xf32, #tpu.memory_space<vmem>>, vector<16x128xf32>
    tpu.vector_store %arg13[%c0_10, %c0_11], %11 {strides = array<i32>} : memref<16x128xf32, #tpu.memory_space<vmem>>, vector<16x128xf32>,
    %c0_i32_12 = arith.constant 0 : i32
    %13 = arith.cmpi eq, %arg1, %c0_i32_12 : i32
    %14 = arith.extui %13 : i1 to i32
    %c0_i32_13 = arith.constant 0 : i32
    %15 = arith.cmpi ne, %14, %c0_i32_13 : i32
    scf.if %15 {
      %c0_14 = arith.constant 0 : index
      %c0_15 = arith.constant 0 : index
      %16 = vector.load %arg13[%c0_14, %c0_15] : memref<16x128xf32, #tpu.memory_space<vmem>>, vector<16x128xf32>
      %c0_16 = arith.constant 0 : index
      %c0_17 = arith.constant 0 : index
      %17 = vector.load %arg5[%c0_16, %c0_17] : memref<1x128xf32, #tpu.memory_space<vmem>>, vector<1x128xf32>
      %18 = vector.broadcast %17 : vector<1x128xf32> to vector<16x128xf32>
      %19 = arith.addf %16, %18 : vector<16x128xf32>
      %cst_18 = arith.constant -2.760410e+01 : f32
      %cst_19 = arith.constant 2.760410e+01 : f32
      %20 = vector.broadcast %cst_18 : f32 to vector<16x128xf32>
      %21 = arith.maximumf %20, %19 : vector<16x128xf32>
      %22 = vector.broadcast %cst_19 : f32 to vector<16x128xf32>
      %23 = arith.minimumf %22, %21 : vector<16x128xf32>
      %c0_20 = arith.constant 0 : index
      %c0_21 = arith.constant 0 : index
      %24 = vector.load %arg7[%c0_20, %c0_21] : memref<1x128xf32, #tpu.memory_space<vmem>>, vector<1x128xf32>
      %c0_22 = arith.constant 0 : index
      %c0_23 = arith.constant 0 : index
      %25 = vector.load %arg6[%c0_22, %c0_23] : memref<128x128xf32, #tpu.memory_space<vmem>>, vector<128x128xf32>
      %cst_24 = arith.constant dense<0.000000e+00> : vector<16x128xf32>
      %26 = tpu.matmul %23, %25, %cst_24 {dimension_numbers = #tpu.dot_dimension_numbers<[1], [0], [0], [1], [0, 0, 1, 1], [], []>} : vector<16x128xf32>, vector<128x128xf32>, vector<16x128xf32> -> vector<16x128xf32>
      %27 = vector.broadcast %24 : vector<1x128xf32> to vector<16x128xf32>
      %28 = arith.addf %26, %27 : vector<16x128xf32>
      %cst_25 = arith.constant 0.000000e+00 : f32
      %29 = vector.broadcast %cst_25 : f32 to vector<16x128xf32>
      %30 = arith.maximumf %28, %29 : vector<16x128xf32>
      %c0_26 = arith.constant 0 : index
      %c0_27 = arith.constant 0 : index
      %31 = vector.load %arg9[%c0_26, %c0_27] : memref<1x128xf32, #tpu.memory_space<vmem>>, vector<1x128xf32>
      %c0_28 = arith.constant 0 : index
      %c0_29 = arith.constant 0 : index
      %32 = vector.load %arg8[%c0_28, %c0_29] : memref<128x128xf32, #tpu.memory_space<vmem>>, vector<128x128xf32>
      %cst_30 = arith.constant dense<0.000000e+00> : vector<16x128xf32>
      %33 = tpu.matmul %30, %32, %cst_30 {dimension_numbers = #tpu.dot_dimension_numbers<[1], [0], [0], [1], [0, 0, 1, 1], [], []>} : vector<16x128xf32>, vector<128x128xf32>, vector<16x128xf32> -> vector<16x128xf32>
      %34 = vector.broadcast %31 : vector<1x128xf32> to vector<16x128xf32>
      %35 = arith.addf %33, %34 : vector<16x128xf32>
      %36 = arith.addf %35, %23 : vector<16x128xf32>
      %cst_31 = arith.constant 0.000000e+00 : f32
      %37 = vector.broadcast %cst_31 : f32 to vector<16x128xf32>
      %38 = arith.maximumf %36, %37 : vector<16x128xf32>
      %c0_32 = arith.constant 0 : index
      %c0_33 = arith.constant 0 : index
      %39 = vector.load %arg11[%c0_32, %c0_33] : memref<1x128xf32, #tpu.memory_space<vmem>>, vector<1x128xf32>
      %c0_34 = arith.constant 0 : index
      %c0_35 = arith.constant 0 : index
      %40 = vector.load %arg10[%c0_34, %c0_35] : memref<128x128xf32, #tpu.memory_space<vmem>>, vector<128x128xf32>
      %cst_36 = arith.constant dense<0.000000e+00> : vector<16x128xf32>
      %41 = tpu.matmul %38, %40, %cst_36 {dimension_numbers = #tpu.dot_dimension_numbers<[1], [0], [0], [1], [0, 0, 1, 1], [], []>} : vector<16x128xf32>, vector<128x128xf32>, vector<16x128xf32> -> vector<16x128xf32>
      %42 = vector.broadcast %39 : vector<1x128xf32> to vector<16x128xf32>
      %43 = arith.addf %41, %42 : vector<16x128xf32>
      %c0_37 = arith.constant 0 : index
      %c0_38 = arith.constant 0 : index
      %44 = vector.load %arg12[%c0_37, %c0_38] : memref<16x128xf32, #tpu.memory_space<vmem>>, vector<16x128xf32>
      tpu.vector_store %arg12[%c0_37, %c0_38], %43 {strides = array<i32>} : memref<16x128xf32, #tpu.memory_space<vmem>>, vector<16x128xf32>,
    } else {
    }
    return
  }
  func.func @transform_0(%arg0: i32, %arg1: i32) -> (i32, i32) {
    %c0_i32 = arith.constant 0 : i32
    %c0_i32_0 = arith.constant 0 : i32
    return %arg0, %c0_i32 : i32, i32
  }
  func.func @transform_1(%arg0: i32, %arg1: i32) -> (i32, i32) {
    %c0_i32 = arith.constant 0 : i32
    %c0_i32_0 = arith.constant 0 : i32
    return %c0_i32, %arg1 : i32, i32
  }
  func.func @transform_2(%arg0: i32, %arg1: i32) -> (i32, i32) {
    %c0_i32 = arith.constant 0 : i32
    %c0_i32_0 = arith.constant 0 : i32
    return %arg1, %c0_i32 : i32, i32
  }
  func.func @transform_3(%arg0: i32, %arg1: i32) -> (i32, i32) {
    %c0_i32 = arith.constant 0 : i32
    %c0_i32_0 = arith.constant 0 : i32
    %c0_i32_1 = arith.constant 0 : i32
    return %c0_i32, %c0_i32_0 : i32, i32
  }
  func.func @transform_4(%arg0: i32, %arg1: i32) -> (i32, i32) {
    %c0_i32 = arith.constant 0 : i32
    %c0_i32_0 = arith.constant 0 : i32
    %c0_i32_1 = arith.constant 0 : i32
    return %c0_i32, %c0_i32_0 : i32, i32
  }
  func.func @transform_5(%arg0: i32, %arg1: i32) -> (i32, i32) {
    %c0_i32 = arith.constant 0 : i32
    %c0_i32_0 = arith.constant 0 : i32
    %c0_i32_1 = arith.constant 0 : i32
    return %c0_i32, %c0_i32_0 : i32, i32
  }
  func.func @transform_6(%arg0: i32, %arg1: i32) -> (i32, i32) {
    %c0_i32 = arith.constant 0 : i32
    %c0_i32_0 = arith.constant 0 : i32
    %c0_i32_1 = arith.constant 0 : i32
    return %c0_i32, %c0_i32_0 : i32, i32
  }
  func.func @transform_7(%arg0: i32, %arg1: i32) -> (i32, i32) {
    %c0_i32 = arith.constant 0 : i32
    %c0_i32_0 = arith.constant 0 : i32
    %c0_i32_1 = arith.constant 0 : i32
    return %c0_i32, %c0_i32_0 : i32, i32
  }
  func.func @transform_8(%arg0: i32, %arg1: i32) -> (i32, i32) {
    %c0_i32 = arith.constant 0 : i32
    %c0_i32_0 = arith.constant 0 : i32
    %c0_i32_1 = arith.constant 0 : i32
    return %c0_i32, %c0_i32_0 : i32, i32
  }
  func.func @transform_9(%arg0: i32, %arg1: i32) -> (i32, i32) {
    %c0_i32 = arith.constant 0 : i32
    %c0_i32_0 = arith.constant 0 : i32
    %c0_i32_1 = arith.constant 0 : i32
    return %c0_i32, %c0_i32_0 : i32, i32
  }
  func.func @transform_10(%arg0: i32, %arg1: i32) -> (i32, i32) {
    %c0_i32 = arith.constant 0 : i32
    %c0_i32_0 = arith.constant 0 : i32
    return %arg0, %c0_i32 : i32, i32
  }
}

</mosaic_0001>

<bundles_post_ra>
// kernel: tpu_custom_call.1
= control target key start
LH: loop header
LB: loop body
LE: loop exit
PB: predicated region body
PF: predicated region fallthrough
CT: control target
= control target key end

     0   :  { %15 = vsyncpa [#allocation4], 0  ;;  %s739_s0 = inlined_call_operand.hbm [shape: f32[16,128], index: 0, kind: input, shape index: {}]   ;;  %s740_s1 = inlined_call_operand.hbm [shape: f32[128,128], index: 1, kind: input, shape index: {}]   ;;  %s741_s2 = inlined_call_operand.hbm [shape: f32[128,128], index: 2, kind: input, shape index: {}]   ;;  %s742_s3 = inlined_call_operand.vmem [shape: f32[1,128], index: 3, kind: input, shape index: {}]   ;;  %s743_s4 = inlined_call_operand.hbm [shape: f32[128,128], index: 4, kind: input, shape index: {}]   ;;  %s744_s5 = inlined_call_operand.vmem [shape: f32[1,128], index: 5, kind: input, shape index: {}]   ;;  %s745_s6 = inlined_call_operand.hbm [shape: f32[128,128], index: 6, kind: input, shape index: {}]   ;;  %s746_s7 = inlined_call_operand.vmem [shape: f32[1,128], index: 7, kind: input, shape index: {}]   ;;  %s747_s8 = inlined_call_operand.hbm [shape: f32[128,128], index: 8, kind: input, shape index: {}]   ;;  %s748_s9 = inlined_call_operand.vmem [shape: f32[1,128], index: 9, kind: input, shape index: {}]   ;;  %s749_s10 = inlined_call_operand.hbm [shape: f32[16,128], index: 10, kind: output, shape index: {}]  }
   0x1   :  { %16 = vsyncpa [#allocation7], 0 }
   0x2   :  { %17 = vsyncpa [#allocation10], 0 }
   0x3   :  { %18 = vsyncpa [#allocation13], 0 }
   0x4   :  { %19 = vsyncpa [#allocation5], 0  ;;  %s37_s15 = sshll.u32 %s740_s1, 4  ;;  %s607_s16 = smov [#allocation6]   ;;  %s38_s15 = int_to_ptr.hbm [resolvable:$true] %s37_s15 }
   0x5   :  { %s39_s17 = sshll.u32 %s607_s16, 4  ;;  %s65_s20 = sshll.u32 %s743_s4, 4  ;;  %s40_s17 = int_to_ptr.vmem [resolvable:$true] %s39_s17  ;;  %s66_s20 = int_to_ptr.hbm [resolvable:$true] %s65_s20 }
   0x6   :  { %s608_s21 = smov 128   ;;  %s609_s22 = smov 8  }
   0x7   :  { %45 = dma.hbm_to_vmem [thread:$0]  %s38_s15, 2048, %s40_s17, [#allocation7], %s608_s21, %s608_s21, %s609_s22  }
   0x8   :  { %s610_s23 = smov [#allocation9]   ;;  %s24_s1 = sshll.u32 %s739_s0, 4  ;;  %s25_s1 = int_to_ptr.hbm [resolvable:$true] %s24_s1 }
   0x9   :  { %s67_s24 = sshll.u32 %s610_s23, 4  ;;  %s50_s28 = sshll.u32 %s741_s2, 4  ;;  %s68_s24 = int_to_ptr.vmem [resolvable:$true] %s67_s24  ;;  %s51_s28 = int_to_ptr.hbm [resolvable:$true] %s50_s28 }
   0xa   :  { %73 = dma.hbm_to_vmem [thread:$0]  %s66_s20, 2048, %s68_s24, [#allocation10], %s608_s21, %s608_s21, %s609_s22  }
   0xb   :  { %s611_s29 = smov [#allocation3]   ;;  %s612_s11 = smov [#allocation8]  }
   0xc   :  { %s26_s30 = sshll.u32 %s611_s29, 4  ;;  %s52_s0 = sshll.u32 %s612_s11, 4  ;;  %s27_s30 = int_to_ptr.vmem [resolvable:$true] %s26_s30  ;;  %s53_s0 = int_to_ptr.vmem [resolvable:$true] %s52_s0 }
   0xd   :  { %32 = dma.hbm_to_vmem [thread:$0]  %s25_s1, 256, %s27_s30, [#allocation4], %s608_s21, %s608_s21, %s609_s22  }
   0xe   :  { %s80_s14 = sshll.u32 %s745_s6, 4  ;;  %s95_s16 = sshll.u32 %s747_s8, 4  ;;  %s81_s14 = int_to_ptr.hbm [resolvable:$true] %s80_s14  ;;  %s96_s16 = int_to_ptr.hbm [resolvable:$true] %s95_s16 }
   0xf   :  { %58 = dma.hbm_to_vmem [thread:$0]  %s51_s28, 2048, %s53_s0, [#allocation7], %s608_s21, %s608_s21, %s609_s22  }
  0x10   :  { %s613_s17 = smov [#allocation11]   ;;  %s614_s19 = smov [#allocation12]  }
  0x11   :  { %s82_s18 = sshll.u32 %s613_s17, 4  ;;  %s97_s6 = sshll.u32 %s614_s19, 4  ;;  %s83_s18 = int_to_ptr.vmem [resolvable:$true] %s82_s18  ;;  %s98_s6 = int_to_ptr.vmem [resolvable:$true] %s97_s6 }
  0x12   :  { %88 = dma.hbm_to_vmem [thread:$0]  %s81_s14, 2048, %s83_s18, [#allocation10], %s608_s21, %s608_s21, %s609_s22  }
  0x13   :  { %103 = dma.hbm_to_vmem [thread:$0]  %s96_s16, 2048, %s98_s6, [#allocation13], %s608_s21, %s608_s21, %s609_s22  }
  0x14   :  { %597 = dma.done.wait [#allocation4], 256  }
  0x15   :  { %598 = vsyncadd [#allocation4], 4294967040 }
  0x16   :  { %599 = dma.done.wait [#allocation7], 4096  }
  0x17   :  { %600 = vsyncadd [#allocation7], 4294963200 }
  0x18   :  { %601 = dma.done.wait [#allocation10], 4096  }
  0x19   :  { %602 = vsyncadd [#allocation10], 4294963200 }
  0x1a   :  { %603 = dma.done.wait [#allocation13], 2048  }
  0x1b   :  { %604 = vsyncadd [#allocation13], 4294965248  ;;  %v153_v0 = vld [vmem:[#allocation6 + $0x78] sm:$0xff]  ;;  %v152_v1 = vld [vmem:[#allocation6 + $0x70] sm:$0xff]  ;;  %s382_s28 = sshll.u32 %s749_s10, 4  ;;  %s383_s28 = int_to_ptr.hbm [resolvable:$true] %s382_s28 }
  0x1c   :  { %154 = vmatpush.msra.mxu0 %v153_v0  ;;  %v151_v2 = vld [vmem:[#allocation6 + $0x68] sm:$0xff]  ;;  %v150_v3 = vld [vmem:[#allocation6 + $0x60] sm:$0xff]  ;;  %v149_v4 = vld [vmem:[#allocation6 + $0x58] sm:$0xff] }
  0x1d   :  { %v148_v5 = vld [vmem:[#allocation6 + $0x50] sm:$0xff]  ;;  %v196_v6 = vld [vmem:[#allocation8 + $0x78] sm:$0xff]  ;;  %v147_v8 = vld [vmem:[#allocation6 + $0x48] sm:$0xff] }
  0x1e   :  { %155 = vmatpush.msra.mxu0 %v152_v1  ;;  %v195_v7 = vld [vmem:[#allocation8 + $0x70] sm:$0xff]  ;;  %197 = vmatpush.msra.mxu1 %v196_v6  ;;  %v194_v9 = vld [vmem:[#allocation8 + $0x68] sm:$0xff]  ;;  %v146_v10 = vld [vmem:[#allocation6 + $0x40] sm:$0xff] }
  0x1f   :  { %v193_v11 = vld [vmem:[#allocation8 + $0x60] sm:$0xff]  ;;  %v145_v12 = vld [vmem:[#allocation6 + $0x38] sm:$0xff]  ;;  %v144_v14 = vld [vmem:[#allocation6 + $0x30] sm:$0xff] }
  0x20   :  { %156 = vmatpush.msra.mxu0 %v151_v2  ;;  %198 = vmatpush.msra.mxu1 %v195_v7  ;;  %v192_v13 = vld [vmem:[#allocation8 + $0x58] sm:$0xff]  ;;  %v191_v15 = vld [vmem:[#allocation8 + $0x50] sm:$0xff]  ;;  %v143_v16 = vld [vmem:[#allocation6 + $0x28] sm:$0xff] }
  0x21   :  { %v190_v17 = vld [vmem:[#allocation8 + $0x48] sm:$0xff]  ;;  %v142_v18 = vld [vmem:[#allocation6 + $0x20] sm:$0xff]  ;;  %v141_v20 = vld [vmem:[#allocation6 + $0x18] sm:$0xff] }
  0x22   :  { %157 = vmatpush.msra.mxu0 %v150_v3  ;;  %199 = vmatpush.msra.mxu1 %v194_v9  ;;  %v189_v19 = vld [vmem:[#allocation8 + $0x40] sm:$0xff]  ;;  %v188_v21 = vld [vmem:[#allocation8 + $0x38] sm:$0xff]  ;;  %v140_v22 = vld [vmem:[#allocation6 + $0x10] sm:$0xff] }
  0x23   :  { %v187_v23 = vld [vmem:[#allocation8 + $0x30] sm:$0xff]  ;;  %v139_v24 = vld [vmem:[#allocation6 + $0x8] sm:$0xff]  ;;  %v138_v26 = vld [vmem:[#allocation6] sm:$0xff] }
  0x24   :  { %158 = vmatpush.msra.mxu0 %v149_v4  ;;  %200 = vmatpush.msra.mxu1 %v193_v11  ;;  %v186_v25 = vld [vmem:[#allocation8 + $0x28] sm:$0xff]  ;;  %v185_v27 = vld [vmem:[#allocation8 + $0x20] sm:$0xff]  ;;  %v136_v28 = vld [vmem:[#allocation3] sm:$0xff] }
  0x25   :  { %v184_v29 = vld [vmem:[#allocation8 + $0x18] sm:$0xff]  ;;  %v183_v30 = vld [vmem:[#allocation8 + $0x10] sm:$0xff]  ;;  %v182_v32 = vld [vmem:[#allocation8 + $0x8] sm:$0xff] }
  0x26   :  { %159 = vmatpush.msra.mxu0 %v148_v5  ;;  %201 = vmatpush.msra.mxu1 %v192_v13  ;;  %v137_v31 = vld [vmem:[#allocation3 + $0x8] sm:$0xff]  ;;  %v181_v33 = vld [vmem:[#allocation8] sm:$0xff]  ;;  %v254_v35 = vld [vmem:[#allocation9 + $0x70] sm:$0xff] }
  0x27   :  { %v255_v34 = vld [vmem:[#allocation9 + $0x78] sm:$0xff]  ;;  %v253_v36 = vld [vmem:[#allocation9 + $0x68] sm:$0xff]  ;;  %v252_v37 = vld [vmem:[#allocation9 + $0x60] sm:$0xff] }
  0x28   :  { %160 = vmatpush.msra.mxu0 %v147_v8  ;;  %202 = vmatpush.msra.mxu1 %v191_v15  ;;  %v251_v38 = vld [vmem:[#allocation9 + $0x58] sm:$0xff]  ;;  %v250_v39 = vld [vmem:[#allocation9 + $0x50] sm:$0xff]  ;;  %v249_v40 = vld [vmem:[#allocation9 + $0x48] sm:$0xff] }
  0x29   :  { %259 = vmatpush.msra.mxu2 %v255_v34  ;;  %v248_v41 = vld [vmem:[#allocation9 + $0x40] sm:$0xff]  ;;  %v247_v42 = vld [vmem:[#allocation9 + $0x38] sm:$0xff]  ;;  %v246_v43 = vld [vmem:[#allocation9 + $0x30] sm:$0xff] }
  0x2a   :  { %161 = vmatpush.msra.mxu0 %v146_v10  ;;  %203 = vmatpush.msra.mxu1 %v190_v17  ;;  %v245_v44 = vld [vmem:[#allocation9 + $0x28] sm:$0xff]  ;;  %v244_v45 = vld [vmem:[#allocation9 + $0x20] sm:$0xff]  ;;  %v243_v48 = vld [vmem:[#allocation9 + $0x18] sm:$0xff] }
  0x2b   :  { %260 = vmatpush.msra.mxu2 %v254_v35  ;;  %v242_v51 = vld [vmem:[#allocation9 + $0x10] sm:$0xff]  ;;  %v241_v52 = vld [vmem:[#allocation9 + $0x8] sm:$0xff]  ;;  %v240_v53 = vld [vmem:[#allocation9] sm:$0xff] }
  0x2c   :  { %162 = vmatpush.msra.mxu0 %v145_v12  ;;  %204 = vmatpush.msra.mxu1 %v189_v19  ;;  %v300_v54 = vld [vmem:[#allocation11 + $0x78] sm:$0xff]  ;;  %v299_v55 = vld [vmem:[#allocation11 + $0x70] sm:$0xff]  ;;  %v298_v56 = vld [vmem:[#allocation11 + $0x68] sm:$0xff] }
  0x2d   :  { %261 = vmatpush.msra.mxu2 %v253_v36  ;;  %304 = vmatpush.msra.mxu3 %v300_v54  ;;  %v297_v57 = vld [vmem:[#allocation11 + $0x60] sm:$0xff]  ;;  %v296_v58 = vld [vmem:[#allocation11 + $0x58] sm:$0xff]  ;;  %v295_v59 = vld [vmem:[#allocation11 + $0x50] sm:$0xff] }
  0x2e   :  { %163 = vmatpush.msra.mxu0 %v144_v14  ;;  %205 = vmatpush.msra.mxu1 %v188_v21  ;;  %v294_v60 = vld [vmem:[#allocation11 + $0x48] sm:$0xff]  ;;  %v293_v61 = vld [vmem:[#allocation11 + $0x40] sm:$0xff]  ;;  %v292_v62 = vld [vmem:[#allocation11 + $0x38] sm:$0xff] }
  0x2f   :  { %262 = vmatpush.msra.mxu2 %v252_v37  ;;  %305 = vmatpush.msra.mxu3 %v299_v55  ;;  %v425_v63 = vld [vmem:[%s742_s3] ss:$0 sm:$0xff]  ;;  %v290_v1 = vld [vmem:[#allocation11 + $0x28] sm:$0xff]  ;;  %v289_v4 = vld [vmem:[#allocation11 + $0x20] sm:$0xff] }
  0x30   :  { %164 = vmatpush.msra.mxu0 %v143_v16  ;;  %206 = vmatpush.msra.mxu1 %v187_v23  ;;  %v291_v0 = vld [vmem:[#allocation11 + $0x30] sm:$0xff]  ;;  %v288_v6 = vld [vmem:[#allocation11 + $0x18] sm:$0xff]  ;;  %v286_v11 = vld [vmem:[#allocation11 + $0x8] sm:$0xff] }
  0x31   :  { %263 = vmatpush.msra.mxu2 %v251_v38  ;;  %306 = vmatpush.msra.mxu3 %v298_v56  ;;  %v287_v10 = vld [vmem:[#allocation11 + $0x10] sm:$0xff]  ;;  %v285_v12 = vld [vmem:[#allocation11] sm:$0xff]  ;;  %v347_v13 = vld [vmem:[#allocation12 + $0x78] sm:$0xff] }
  0x32   :  { %165 = vmatpush.msra.mxu0 %v142_v18  ;;  %207 = vmatpush.msra.mxu1 %v186_v25  ;;  %v346_v14 = vld [vmem:[#allocation12 + $0x70] sm:$0xff]  ;;  %v345_v15 = vld [vmem:[#allocation12 + $0x68] sm:$0xff]  ;;  %v344_v16 = vld [vmem:[#allocation12 + $0x60] sm:$0xff] }
  0x33   :  { %264 = vmatpush.msra.mxu2 %v250_v39  ;;  %307 = vmatpush.msra.mxu3 %v297_v57  ;;  %v343_v17 = vld [vmem:[#allocation12 + $0x58] sm:$0xff]  ;;  %v342_v18 = vld [vmem:[#allocation12 + $0x50] sm:$0xff]  ;;  %v341_v19 = vld [vmem:[#allocation12 + $0x48] sm:$0xff] }
  0x34   :  { %166 = vmatpush.msra.mxu0 %v141_v20  ;;  %208 = vmatpush.msra.mxu1 %v185_v27  ;;  %v340_v20 = vld [vmem:[#allocation12 + $0x40] sm:$0xff]  ;;  %v339_v21 = vld [vmem:[#allocation12 + $0x38] sm:$0xff]  ;;  %v338_v23 = vld [vmem:[#allocation12 + $0x30] sm:$0xff] }
  0x35   :  { %265 = vmatpush.msra.mxu2 %v249_v40  ;;  %308 = vmatpush.msra.mxu3 %v296_v58  ;;  %v336_v27 = vld [vmem:[#allocation12 + $0x20] sm:$0xff]  ;;  %v333_v34 = vld [vmem:[#allocation12 + $0x8] sm:$0xff]  ;;  %v427_v36 = vld [vmem:[%s746_s7] ss:$0 sm:$0xff]  ;;  %s615_s7 = smov [#allocation14]  }
  0x36   :  { %167 = vmatpush.msra.mxu0 %v140_v22  ;;  %209 = vmatpush.msra.mxu1 %v184_v29  ;;  %v426_v22 = vld [vmem:[%s744_s5] ss:$0 sm:$0xff]  ;;  %v332_v35 = vld [vmem:[#allocation12] sm:$0xff]  ;;  %s380_s1 = sshll.u32 %s615_s7, 4  ;;  %s381_s1 = int_to_ptr.vmem [resolvable:$true] %s380_s1 }
  0x37   :  { %266 = vmatpush.msra.mxu2 %v248_v41  ;;  %309 = vmatpush.msra.mxu3 %v295_v59 }
  0x38   :  { %168 = vmatpush.msra.mxu0 %v139_v24  ;;  %210 = vmatpush.msra.mxu1 %v183_v30  ;;  %v337_v24 = vld [vmem:[#allocation12 + $0x28] sm:$0xff] }
  0x39   :  { %267 = vmatpush.msra.mxu2 %v247_v42  ;;  %310 = vmatpush.msra.mxu3 %v294_v60 }
  0x3a   :  { %169 = vmatpush.msra.mxu0 %v138_v26  ;;  %211 = vmatpush.msra.mxu1 %v182_v32  ;;  %v335_v32 = vld [vmem:[#allocation12 + $0x18] sm:$0xff] }
  0x3b   :  { %170 = vmatmul.f32.vlgmr.msra.gmra.mxu0 %v136_v28  ;;  %268 = vmatpush.msra.mxu2 %v246_v43 }
  0x3c   :  { %212 = vmatpush.msra.mxu1 %v181_v33  ;;  %311 = vmatpush.msra.mxu3 %v293_v61  ;;  %v334_v33 = vld [vmem:[#allocation12 + $0x10] sm:$0xff] }
  0x3d   :  { %269 = vmatpush.msra.mxu2 %v245_v44  ;;  %351 = vmatpush.msrb.mxu0 %v347_v13 }
  0x3e   :  { %312 = vmatpush.msra.mxu3 %v292_v62  ;;  %400 = vmatpush.msrb.mxu1 %v347_v13 }
  0x3f   :  { %270 = vmatpush.msra.mxu2 %v244_v45  ;;  %352 = vmatpush.msrb.mxu0 %v346_v14  ;;  %v428_v45 = vld [vmem:[%s748_s9] ss:$0 sm:$0xff] }
  0x40   :  { %313 = vmatpush.msra.mxu3 %v291_v0  ;;  %401 = vmatpush.msrb.mxu1 %v346_v14 }
  0x41   :  { %271 = vmatpush.msra.mxu2 %v243_v48  ;;  %353 = vmatpush.msrb.mxu0 %v345_v15 }
  0x42   :  { %314 = vmatpush.msra.mxu3 %v290_v1  ;;  %402 = vmatpush.msrb.mxu1 %v345_v15 }
  0x43   :  { %173 = vmatmul.f32.gmra.mxu0 %v137_v31  ;;  %272 = vmatpush.msra.mxu2 %v242_v51 }
  0x44   :  { %315 = vmatpush.msra.mxu3 %v289_v4  ;;  %354 = vmatpush.msrb.mxu0 %v344_v16 }
  0x45   :  { %273 = vmatpush.msra.mxu2 %v241_v52  ;;  %403 = vmatpush.msrb.mxu1 %v344_v16 }
  0x46   :  { %316 = vmatpush.msra.mxu3 %v288_v6  ;;  %355 = vmatpush.msrb.mxu0 %v343_v17 }
  0x47   :  { %274 = vmatpush.msra.mxu2 %v240_v53  ;;  %404 = vmatpush.msrb.mxu1 %v343_v17 }
  0x48   :  { %317 = vmatpush.msra.mxu3 %v287_v10  ;;  %356 = vmatpush.msrb.mxu0 %v342_v18 }
  0x49   :  { %405 = vmatpush.msrb.mxu1 %v342_v18 }
  0x4a   :  { %318 = vmatpush.msra.mxu3 %v286_v11  ;;  %357 = vmatpush.msrb.mxu0 %v341_v19 }
  0x4b   :  { %406 = vmatpush.msrb.mxu1 %v341_v19 }
  0x4c   :  { %319 = vmatpush.msra.mxu3 %v285_v12  ;;  %358 = vmatpush.msrb.mxu0 %v340_v20 }
  0x4d   :  { %407 = vmatpush.msrb.mxu1 %v340_v20 }
  0x4e   :  { %359 = vmatpush.msrb.mxu0 %v339_v21 }
  0x4f   :  { %408 = vmatpush.msrb.mxu1 %v339_v21 }
  0x50   :  { %360 = vmatpush.msrb.mxu0 %v338_v23 }
  0x51   :  { %409 = vmatpush.msrb.mxu1 %v338_v23 }
  0x52   :  { %361 = vmatpush.msrb.mxu0 %v337_v24 }
  0x53   :  { %410 = vmatpush.msrb.mxu1 %v337_v24 }
  0x54   :  { %362 = vmatpush.msrb.mxu0 %v336_v27 }
  0x55   :  { %411 = vmatpush.msrb.mxu1 %v336_v27 }
  0x56   :  { %363 = vmatpush.msrb.mxu0 %v335_v32 }
  0x57   :  { %412 = vmatpush.msrb.mxu1 %v335_v32 }
  0x58   :  { %364 = vmatpush.msrb.mxu0 %v334_v33 }
  0x59   :  { %413 = vmatpush.msrb.mxu1 %v334_v33 }
  0x5a   :  { %365 = vmatpush.msrb.mxu0 %v333_v34 }
  0x5b   :  { %414 = vmatpush.msrb.mxu1 %v333_v34 }
  0x5c   :  { %366 = vmatpush.msrb.mxu0 %v332_v35 }
  0x5d   :  { %415 = vmatpush.msrb.mxu1 %v332_v35 }
  0xb8   :  { %v171_v46 = vpop.f32.mrf.mxu0 }
  0xb9   :  { %v177_v47 = vmax.f32 %v171_v46, 0.0 }
  0xbb   :  { %213 = vmatmul.f32.vlgmr.msra.gmra.mxu1 %v177_v47 }
  0xc0   :  { %v174_v49 = vpop.f32.mrf.mxu0 }
  0xc1   :  { %v178_v50 = vmax.f32 %v174_v49, 0.0 }
  0xc3   :  { %216 = vmatmul.f32.gmra.mxu1 %v178_v50 }
 0x138   :  { %v214_v2 = vpop.f32.mrf.mxu1 }
 0x139   :  { %v710_v3 = vadd.f32 %v425_v63, %v214_v2 }
 0x13b   :  { %v398_v5 = vclamps-f32 %v710_v3, 27.6041 }
 0x13d   :  { %275 = vmatmul.f32.vlgmr.msra.gmra.mxu2 %v398_v5 }
 0x140   :  { %v217_v7 = vpop.f32.mrf.mxu1 }
 0x141   :  { %v715_v8 = vadd.f32 %v425_v63, %v217_v7 }
 0x143   :  { %v399_v9 = vclamps-f32 %v715_v8, 27.6041 }
 0x145   :  { %278 = vmatmul.f32.gmra.mxu2 %v399_v9 }
 0x1c0   :  { %v276_v25 = vpop.f32.mrf.mxu2 }
 0x1c1   :  { %v277_v26 = vadd.f32 %v426_v22, %v276_v25 }
 0x1c3   :  { %v282_v28 = vmax.f32 %v277_v26, 0.0 }
 0x1c5   :  { %320 = vmatmul.f32.vlgmr.msra.gmra.mxu3 %v282_v28 }
 0x1c8   :  { %v279_v29 = vpop.f32.mrf.mxu2 }
 0x1c9   :  { %v280_v30 = vadd.f32 %v426_v22, %v279_v29 }
 0x1cb   :  { %v283_v31 = vmax.f32 %v280_v30, 0.0 }
 0x1cd   :  { %323 = vmatmul.f32.gmra.mxu3 %v283_v31 }
 0x248   :  { %v321_v37 = vpop.f32.mrf.mxu3 }
 0x249   :  { %v322_v38 = vadd.f32 %v427_v36, %v321_v37 }
 0x24b   :  { %v327_v39 = vadd.f32 %v398_v5, %v322_v38 }
 0x24d   :  { %v329_v40 = vmax.f32 %v327_v39, 0.0 }
 0x24f   :  { %367 = vmatmul.f32.vlgmr.msrb.gmra.mxu0 %v329_v40 }
 0x250   :  { %v324_v41 = vpop.f32.mrf.mxu3 }
 0x251   :  { %v325_v42 = vadd.f32 %v427_v36, %v324_v41 }
 0x253   :  { %v328_v43 = vadd.f32 %v399_v9, %v325_v42 }
 0x255   :  { %v330_v44 = vmax.f32 %v328_v43, 0.0 }
 0x257   :  { %370 = vmatmul.f32.vlgmr.msrb.gmra.mxu1 %v330_v44 }
 0x2cc   :  { %v368_v46 = vpop.f32.mrf.mxu0 }
 0x2cd   :  { %v369_v47 = vadd.f32 %v428_v45, %v368_v46 }
 0x2cf   :  { %374 = vst [vmem:[#allocation14] sm:$0xff] %v369_v47 }
 0x2d4   :  { %v371_v48 = vpop.f32.mrf.mxu1 }
 0x2d5   :  { %v372_v49 = vadd.f32 %v428_v45, %v371_v48 }
 0x2d7   :  { %375 = vst [vmem:[#allocation14 + $0x8] sm:$0xff] %v372_v49 }
 0x2d8   :  { %388 = dma.vmem_to_hbm [thread:$0]  %s381_s1, 256, %s383_s28, [#allocation5], %s608_s21, %s608_s21, %s609_s22  }
 0x2d9   :  { %605 = dma.done.wait [#allocation5], 256  }
 0x2da   :  { %606 = vsyncadd [#allocation5], 4294967040 }
 0x2db   :  { %393 = vsyncpa [#allocation4], 1 }
 0x2dc   :  { %394 = vsyncpa [#allocation7], 1 }
 0x2dd   :  { %395 = vsyncpa [#allocation10], 1 }
 0x2de   :  { %396 = vsyncpa [#allocation13], 1 }
 0x2df   :  { %397 = vsyncpa [#allocation5], 1 }

// kernel: tpu_custom_call.1
= control target key start
LH: loop header
LB: loop body
LE: loop exit
PB: predicated region body
PF: predicated region fallthrough
CT: control target
= control target key end

     0   :  { %15 = vsyncpa [#allocation4], 0  ;;  %s739_s0 = inlined_call_operand.hbm [shape: f32[16,128], index: 0, kind: input, shape index: {}]   ;;  %s740_s1 = inlined_call_operand.hbm [shape: f32[128,128], index: 1, kind: input, shape index: {}]   ;;  %s741_s2 = inlined_call_operand.hbm [shape: f32[128,128], index: 2, kind: input, shape index: {}]   ;;  %s742_s3 = inlined_call_operand.vmem [shape: f32[1,128], index: 3, kind: input, shape index: {}]   ;;  %s743_s4 = inlined_call_operand.hbm [shape: f32[128,128], index: 4, kind: input, shape index: {}]   ;;  %s744_s5 = inlined_call_operand.vmem [shape: f32[1,128], index: 5, kind: input, shape index: {}]   ;;  %s745_s6 = inlined_call_operand.hbm [shape: f32[128,128], index: 6, kind: input, shape index: {}]   ;;  %s746_s7 = inlined_call_operand.vmem [shape: f32[1,128], index: 7, kind: input, shape index: {}]   ;;  %s747_s8 = inlined_call_operand.hbm [shape: f32[128,128], index: 8, kind: input, shape index: {}]   ;;  %s748_s9 = inlined_call_operand.vmem [shape: f32[1,128], index: 9, kind: input, shape index: {}]   ;;  %s749_s10 = inlined_call_operand.hbm [shape: f32[16,128], index: 10, kind: output, shape index: {}]  }
   0x1   :  { %16 = vsyncpa [#allocation7], 0 }
   0x2   :  { %17 = vsyncpa [#allocation10], 0 }
   0x3   :  { %18 = vsyncpa [#allocation13], 0 }
   0x4   :  { %19 = vsyncpa [#allocation5], 0  ;;  %s37_s15 = sshll.u32 %s740_s1, 4  ;;  %s607_s16 = smov [#allocation6]   ;;  %s38_s15 = int_to_ptr.hbm [resolvable:$true] %s37_s15 }
   0x5   :  { %s39_s17 = sshll.u32 %s607_s16, 4  ;;  %s65_s20 = sshll.u32 %s743_s4, 4  ;;  %s40_s17 = int_to_ptr.vmem [resolvable:$true] %s39_s17  ;;  %s66_s20 = int_to_ptr.hbm [resolvable:$true] %s65_s20 }
   0x6   :  { %s608_s21 = smov 128   ;;  %s609_s22 = smov 8  }
   0x7   :  { %45 = dma.hbm_to_vmem [thread:$0]  %s38_s15, 2048, %s40_s17, [#allocation7], %s608_s21, %s608_s21, %s609_s22  }
   0x8   :  { %s610_s23 = smov [#allocation9]   ;;  %s24_s1 = sshll.u32 %s739_s0, 4  ;;  %s25_s1 = int_to_ptr.hbm [resolvable:$true] %s24_s1 }
   0x9   :  { %s67_s24 = sshll.u32 %s610_s23, 4  ;;  %s50_s28 = sshll.u32 %s741_s2, 4  ;;  %s68_s24 = int_to_ptr.vmem [resolvable:$true] %s67_s24  ;;  %s51_s28 = int_to_ptr.hbm [resolvable:$true] %s50_s28 }
   0xa   :  { %73 = dma.hbm_to_vmem [thread:$0]  %s66_s20, 2048, %s68_s24, [#allocation10], %s608_s21, %s608_s21, %s609_s22  }
   0xb   :  { %s611_s29 = smov [#allocation3]   ;;  %s612_s11 = smov [#allocation8]  }
   0xc   :  { %s26_s30 = sshll.u32 %s611_s29, 4  ;;  %s52_s0 = sshll.u32 %s612_s11, 4  ;;  %s27_s30 = int_to_ptr.vmem [resolvable:$true] %s26_s30  ;;  %s53_s0 = int_to_ptr.vmem [resolvable:$true] %s52_s0 }
   0xd   :  { %32 = dma.hbm_to_vmem [thread:$0]  %s25_s1, 256, %s27_s30, [#allocation4], %s608_s21, %s608_s21, %s609_s22  }
   0xe   :  { %s80_s14 = sshll.u32 %s745_s6, 4  ;;  %s95_s16 = sshll.u32 %s747_s8, 4  ;;  %s81_s14 = int_to_ptr.hbm [resolvable:$true] %s80_s14  ;;  %s96_s16 = int_to_ptr.hbm [resolvable:$true] %s95_s16 }
   0xf   :  { %58 = dma.hbm_to_vmem [thread:$0]  %s51_s28, 2048, %s53_s0, [#allocation7], %s608_s21, %s608_s21, %s609_s22  }
  0x10   :  { %s613_s17 = smov [#allocation11]   ;;  %s614_s19 = smov [#allocation12]  }
  0x11   :  { %s82_s18 = sshll.u32 %s613_s17, 4  ;;  %s97_s6 = sshll.u32 %s614_s19, 4  ;;  %s83_s18 = int_to_ptr.vmem [resolvable:$true] %s82_s18  ;;  %s98_s6 = int_to_ptr.vmem [resolvable:$true] %s97_s6 }
  0x12   :  { %88 = dma.hbm_to_vmem [thread:$0]  %s81_s14, 2048, %s83_s18, [#allocation10], %s608_s21, %s608_s21, %s609_s22  }
  0x13   :  { %103 = dma.hbm_to_vmem [thread:$0]  %s96_s16, 2048, %s98_s6, [#allocation13], %s608_s21, %s608_s21, %s609_s22  }
  0x14   :  { %597 = dma.done.wait [#allocation4], 256  }
  0x15   :  { %598 = vsyncadd [#allocation4], 4294967040 }
  0x16   :  { %599 = dma.done.wait [#allocation7], 4096  }
  0x17   :  { %600 = vsyncadd [#allocation7], 4294963200 }
  0x18   :  { %601 = dma.done.wait [#allocation10], 4096  }
  0x19   :  { %602 = vsyncadd [#allocation10], 4294963200 }
  0x1a   :  { %603 = dma.done.wait [#allocation13], 2048  }
  0x1b   :  { %604 = vsyncadd [#allocation13], 4294965248  ;;  %v153_v0 = vld [vmem:[#allocation6 + $0x78] sm:$0xff]  ;;  %v152_v1 = vld [vmem:[#allocation6 + $0x70] sm:$0xff]  ;;  %s382_s28 = sshll.u32 %s749_s10, 4  ;;  %s383_s28 = int_to_ptr.hbm [resolvable:$true] %s382_s28 }
  0x1c   :  { %154 = vmatpush.msra.mxu0 %v153_v0  ;;  %v151_v2 = vld [vmem:[#allocation6 + $0x68] sm:$0xff]  ;;  %v150_v3 = vld [vmem:[#allocation6 + $0x60] sm:$0xff]  ;;  %v149_v4 = vld [vmem:[#allocation6 + $0x58] sm:$0xff] }
  0x1d   :  { %v148_v5 = vld [vmem:[#allocation6 + $0x50] sm:$0xff]  ;;  %v196_v6 = vld [vmem:[#allocation8 + $0x78] sm:$0xff]  ;;  %v147_v8 = vld [vmem:[#allocation6 + $0x48] sm:$0xff] }
  0x1e   :  { %155 = vmatpush.msra.mxu0 %v152_v1  ;;  %v195_v7 = vld [vmem:[#allocation8 + $0x70] sm:$0xff]  ;;  %197 = vmatpush.msra.mxu1 %v196_v6  ;;  %v194_v9 = vld [vmem:[#allocation8 + $0x68] sm:$0xff]  ;;  %v146_v10 = vld [vmem:[#allocation6 + $0x40] sm:$0xff] }
  0x1f   :  { %v193_v11 = vld [vmem:[#allocation8 + $0x60] sm:$0xff]  ;;  %v145_v12 = vld [vmem:[#allocation6 + $0x38] sm:$0xff]  ;;  %v144_v14 = vld [vmem:[#allocation6 + $0x30] sm:$0xff] }
  0x20   :  { %156 = vmatpush.msra.mxu0 %v151_v2  ;;  %198 = vmatpush.msra.mxu1 %v195_v7  ;;  %v192_v13 = vld [vmem:[#allocation8 + $0x58] sm:$0xff]  ;;  %v191_v15 = vld [vmem:[#allocation8 + $0x50] sm:$0xff]  ;;  %v143_v16 = vld [vmem:[#allocation6 + $0x28] sm:$0xff] }
  0x21   :  { %v190_v17 = vld [vmem:[#allocation8 + $0x48] sm:$0xff]  ;;  %v142_v18 = vld [vmem:[#allocation6 + $0x20] sm:$0xff]  ;;  %v141_v20 = vld [vmem:[#allocation6 + $0x18] sm:$0xff] }
  0x22   :  { %157 = vmatpush.msra.mxu0 %v150_v3  ;;  %199 = vmatpush.msra.mxu1 %v194_v9  ;;  %v189_v19 = vld [vmem:[#allocation8 + $0x40] sm:$0xff]  ;;  %v188_v21 = vld [vmem:[#allocation8 + $0x38] sm:$0xff]  ;;  %v140_v22 = vld [vmem:[#allocation6 + $0x10] sm:$0xff] }
  0x23   :  { %v187_v23 = vld [vmem:[#allocation8 + $0x30] sm:$0xff]  ;;  %v139_v24 = vld [vmem:[#allocation6 + $0x8] sm:$0xff]  ;;  %v138_v26 = vld [vmem:[#allocation6] sm:$0xff] }
  0x24   :  { %158 = vmatpush.msra.mxu0 %v149_v4  ;;  %200 = vmatpush.msra.mxu1 %v193_v11  ;;  %v186_v25 = vld [vmem:[#allocation8 + $0x28] sm:$0xff]  ;;  %v185_v27 = vld [vmem:[#allocation8 + $0x20] sm:$0xff]  ;;  %v136_v28 = vld [vmem:[#allocation3] sm:$0xff] }
  0x25   :  { %v184_v29 = vld [vmem:[#allocation8 + $0x18] sm:$0xff]  ;;  %v183_v30 = vld [vmem:[#allocation8 + $0x10] sm:$0xff]  ;;  %v182_v32 = vld [vmem:[#allocation8 + $0x8] sm:$0xff] }
  0x26   :  { %159 = vmatpush.msra.mxu0 %v148_v5  ;;  %201 = vmatpush.msra.mxu1 %v192_v13  ;;  %v137_v31 = vld [vmem:[#allocation3 + $0x8] sm:$0xff]  ;;  %v181_v33 = vld [vmem:[#allocation8] sm:$0xff]  ;;  %v254_v35 = vld [vmem:[#allocation9 + $0x70] sm:$0xff] }
  0x27   :  { %v255_v34 = vld [vmem:[#allocation9 + $0x78] sm:$0xff]  ;;  %v253_v36 = vld [vmem:[#allocation9 + $0x68] sm:$0xff]  ;;  %v252_v37 = vld [vmem:[#allocation9 + $0x60] sm:$0xff] }
  0x28   :  { %160 = vmatpush.msra.mxu0 %v147_v8  ;;  %202 = vmatpush.msra.mxu1 %v191_v15  ;;  %v251_v38 = vld [vmem:[#allocation9 + $0x58] sm:$0xff]  ;;  %v250_v39 = vld [vmem:[#allocation9 + $0x50] sm:$0xff]  ;;  %v249_v40 = vld [vmem:[#allocation9 + $0x48] sm:$0xff] }
  0x29   :  { %259 = vmatpush.msra.mxu2 %v255_v34  ;;  %v248_v41 = vld [vmem:[#allocation9 + $0x40] sm:$0xff]  ;;  %v247_v42 = vld [vmem:[#allocation9 + $0x38] sm:$0xff]  ;;  %v246_v43 = vld [vmem:[#allocation9 + $0x30] sm:$0xff] }
  0x2a   :  { %161 = vmatpush.msra.mxu0 %v146_v10  ;;  %203 = vmatpush.msra.mxu1 %v190_v17  ;;  %v245_v44 = vld [vmem:[#allocation9 + $0x28] sm:$0xff]  ;;  %v244_v45 = vld [vmem:[#allocation9 + $0x20] sm:$0xff]  ;;  %v243_v48 = vld [vmem:[#allocation9 + $0x18] sm:$0xff] }
  0x2b   :  { %260 = vmatpush.msra.mxu2 %v254_v35  ;;  %v242_v51 = vld [vmem:[#allocation9 + $0x10] sm:$0xff]  ;;  %v241_v52 = vld [vmem:[#allocation9 + $0x8] sm:$0xff]  ;;  %v240_v53 = vld [vmem:[#allocation9] sm:$0xff] }
  0x2c   :  { %162 = vmatpush.msra.mxu0 %v145_v12  ;;  %204 = vmatpush.msra.mxu1 %v189_v19  ;;  %v300_v54 = vld [vmem:[#allocation11 + $0x78] sm:$0xff]  ;;  %v299_v55 = vld [vmem:[#allocation11 + $0x70] sm:$0xff]  ;;  %v298_v56 = vld [vmem:[#allocation11 + $0x68] sm:$0xff] }
  0x2d   :  { %261 = vmatpush.msra.mxu2 %v253_v36  ;;  %304 = vmatpush.msra.mxu3 %v300_v54  ;;  %v297_v57 = vld [vmem:[#allocation11 + $0x60] sm:$0xff]  ;;  %v296_v58 = vld [vmem:[#allocation11 + $0x58] sm:$0xff]  ;;  %v295_v59 = vld [vmem:[#allocation11 + $0x50] sm:$0xff] }
  0x2e   :  { %163 = vmatpush.msra.mxu0 %v144_v14  ;;  %205 = vmatpush.msra.mxu1 %v188_v21  ;;  %v294_v60 = vld [vmem:[#allocation11 + $0x48] sm:$0xff]  ;;  %v293_v61 = vld [vmem:[#allocation11 + $0x40] sm:$0xff]  ;;  %v292_v62 = vld [vmem:[#allocation11 + $0x38] sm:$0xff] }
  0x2f   :  { %262 = vmatpush.msra.mxu2 %v252_v37  ;;  %305 = vmatpush.msra.mxu3 %v299_v55  ;;  %v425_v63 = vld [vmem:[%s742_s3] ss:$0 sm:$0xff]  ;;  %v290_v1 = vld [vmem:[#allocation11 + $0x28] sm:$0xff]  ;;  %v289_v4 = vld [vmem:[#allocation11 + $0x20] sm:$0xff] }
  0x30   :  { %164 = vmatpush.msra.mxu0 %v143_v16  ;;  %206 = vmatpush.msra.mxu1 %v187_v23  ;;  %v291_v0 = vld [vmem:[#allocation11 + $0x30] sm:$0xff]  ;;  %v288_v6 = vld [vmem:[#allocation11 + $0x18] sm:$0xff]  ;;  %v286_v11 = vld [vmem:[#allocation11 + $0x8] sm:$0xff] }
  0x31   :  { %263 = vmatpush.msra.mxu2 %v251_v38  ;;  %306 = vmatpush.msra.mxu3 %v298_v56  ;;  %v287_v10 = vld [vmem:[#allocation11 + $0x10] sm:$0xff]  ;;  %v285_v12 = vld [vmem:[#allocation11] sm:$0xff]  ;;  %v347_v13 = vld [vmem:[#allocation12 + $0x78] sm:$0xff] }
  0x32   :  { %165 = vmatpush.msra.mxu0 %v142_v18  ;;  %207 = vmatpush.msra.mxu1 %v186_v25  ;;  %v346_v14 = vld [vmem:[#allocation12 + $0x70] sm:$0xff]  ;;  %v345_v15 = vld [vmem:[#allocation12 + $0x68] sm:$0xff]  ;;  %v344_v16 = vld [vmem:[#allocation12 + $0x60] sm:$0xff] }
  0x33   :  { %264 = vmatpush.msra.mxu2 %v250_v39  ;;  %307 = vmatpush.msra.mxu3 %v297_v57  ;;  %v343_v17 = vld [vmem:[#allocation12 + $0x58] sm:$0xff]  ;;  %v342_v18 = vld [vmem:[#allocation12 + $0x50] sm:$0xff]  ;;  %v341_v19 = vld [vmem:[#allocation12 + $0x48] sm:$0xff] }
  0x34   :  { %166 = vmatpush.msra.mxu0 %v141_v20  ;;  %208 = vmatpush.msra.mxu1 %v185_v27  ;;  %v340_v20 = vld [vmem:[#allocation12 + $0x40] sm:$0xff]  ;;  %v339_v21 = vld [vmem:[#allocation12 + $0x38] sm:$0xff]  ;;  %v338_v23 = vld [vmem:[#allocation12 + $0x30] sm:$0xff] }
  0x35   :  { %265 = vmatpush.msra.mxu2 %v249_v40  ;;  %308 = vmatpush.msra.mxu3 %v296_v58  ;;  %v336_v27 = vld [vmem:[#allocation12 + $0x20] sm:$0xff]  ;;  %v333_v34 = vld [vmem:[#allocation12 + $0x8] sm:$0xff]  ;;  %v427_v36 = vld [vmem:[%s746_s7] ss:$0 sm:$0xff]  ;;  %s615_s7 = smov [#allocation14]  }
  0x36   :  { %167 = vmatpush.msra.mxu0 %v140_v22  ;;  %209 = vmatpush.msra.mxu1 %v184_v29  ;;  %v426_v22 = vld [vmem:[%s744_s5] ss:$0 sm:$0xff]  ;;  %v332_v35 = vld [vmem:[#allocation12] sm:$0xff]  ;;  %s380_s1 = sshll.u32 %s615_s7, 4  ;;  %s381_s1 = int_to_ptr.vmem [resolvable:$true] %s380_s1 }
  0x37   :  { %266 = vmatpush.msra.mxu2 %v248_v41  ;;  %309 = vmatpush.msra.mxu3 %v295_v59 }
  0x38   :  { %168 = vmatpush.msra.mxu0 %v139_v24  ;;  %210 = vmatpush.msra.mxu1 %v183_v30  ;;  %v337_v24 = vld [vmem:[#allocation12 + $0x28] sm:$0xff] }
  0x39   :  { %267 = vmatpush.msra.mxu2 %v247_v42  ;;  %310 = vmatpush.msra.mxu3 %v294_v60 }
  0x3a   :  { %169 = vmatpush.msra.mxu0 %v138_v26  ;;  %211 = vmatpush.msra.mxu1 %v182_v32  ;;  %v335_v32 = vld [vmem:[#allocation12 + $0x18] sm:$0xff] }
  0x3b   :  { %170 = vmatmul.f32.vlgmr.msra.gmra.mxu0 %v136_v28  ;;  %268 = vmatpush.msra.mxu2 %v246_v43 }
  0x3c   :  { %212 = vmatpush.msra.mxu1 %v181_v33  ;;  %311 = vmatpush.msra.mxu3 %v293_v61  ;;  %v334_v33 = vld [vmem:[#allocation12 + $0x10] sm:$0xff] }
  0x3d   :  { %269 = vmatpush.msra.mxu2 %v245_v44  ;;  %351 = vmatpush.msrb.mxu0 %v347_v13 }
  0x3e   :  { %312 = vmatpush.msra.mxu3 %v292_v62  ;;  %400 = vmatpush.msrb.mxu1 %v347_v13 }
  0x3f   :  { %270 = vmatpush.msra.mxu2 %v244_v45  ;;  %352 = vmatpush.msrb.mxu0 %v346_v14  ;;  %v428_v45 = vld [vmem:[%s748_s9] ss:$0 sm:$0xff] }
  0x40   :  { %313 = vmatpush.msra.mxu3 %v291_v0  ;;  %401 = vmatpush.msrb.mxu1 %v346_v14 }
  0x41   :  { %271 = vmatpush.msra.mxu2 %v243_v48  ;;  %353 = vmatpush.msrb.mxu0 %v345_v15 }
  0x42   :  { %314 = vmatpush.msra.mxu3 %v290_v1  ;;  %402 = vmatpush.msrb.mxu1 %v345_v15 }
  0x43   :  { %173 = vmatmul.f32.gmra.mxu0 %v137_v31  ;;  %272 = vmatpush.msra.mxu2 %v242_v51 }
  0x44   :  { %315 = vmatpush.msra.mxu3 %v289_v4  ;;  %354 = vmatpush.msrb.mxu0 %v344_v16 }
  0x45   :  { %273 = vmatpush.msra.mxu2 %v241_v52  ;;  %403 = vmatpush.msrb.mxu1 %v344_v16 }
  0x46   :  { %316 = vmatpush.msra.mxu3 %v288_v6  ;;  %355 = vmatpush.msrb.mxu0 %v343_v17 }
  0x47   :  { %274 = vmatpush.msra.mxu2 %v240_v53  ;;  %404 = vmatpush.msrb.mxu1 %v343_v17 }
  0x48   :  { %317 = vmatpush.msra.mxu3 %v287_v10  ;;  %356 = vmatpush.msrb.mxu0 %v342_v18 }
  0x49   :  { %405 = vmatpush.msrb.mxu1 %v342_v18 }
  0x4a   :  { %318 = vmatpush.msra.mxu3 %v286_v11  ;;  %357 = vmatpush.msrb.mxu0 %v341_v19 }
  0x4b   :  { %406 = vmatpush.msrb.mxu1 %v341_v19 }
  0x4c   :  { %319 = vmatpush.msra.mxu3 %v285_v12  ;;  %358 = vmatpush.msrb.mxu0 %v340_v20 }
  0x4d   :  { %407 = vmatpush.msrb.mxu1 %v340_v20 }
  0x4e   :  { %359 = vmatpush.msrb.mxu0 %v339_v21 }
  0x4f   :  { %408 = vmatpush.msrb.mxu1 %v339_v21 }
  0x50   :  { %360 = vmatpush.msrb.mxu0 %v338_v23 }
  0x51   :  { %409 = vmatpush.msrb.mxu1 %v338_v23 }
  0x52   :  { %361 = vmatpush.msrb.mxu0 %v337_v24 }
  0x53   :  { %410 = vmatpush.msrb.mxu1 %v337_v24 }
  0x54   :  { %362 = vmatpush.msrb.mxu0 %v336_v27 }
  0x55   :  { %411 = vmatpush.msrb.mxu1 %v336_v27 }
  0x56   :  { %363 = vmatpush.msrb.mxu0 %v335_v32 }
  0x57   :  { %412 = vmatpush.msrb.mxu1 %v335_v32 }
  0x58   :  { %364 = vmatpush.msrb.mxu0 %v334_v33 }
  0x59   :  { %413 = vmatpush.msrb.mxu1 %v334_v33 }
  0x5a   :  { %365 = vmatpush.msrb.mxu0 %v333_v34 }
  0x5b   :  { %414 = vmatpush.msrb.mxu1 %v333_v34 }
  0x5c   :  { %366 = vmatpush.msrb.mxu0 %v332_v35 }
  0x5d   :  { %415 = vmatpush.msrb.mxu1 %v332_v35 }
  0xb8   :  { %v171_v46 = vpop.f32.mrf.mxu0 }
  0xb9   :  { %v177_v47 = vmax.f32 %v171_v46, 0.0 }
  0xbb   :  { %213 = vmatmul.f32.vlgmr.msra.gmra.mxu1 %v177_v47 }
  0xc0   :  { %v174_v49 = vpop.f32.mrf.mxu0 }
  0xc1   :  { %v178_v50 = vmax.f32 %v174_v49, 0.0 }
  0xc3   :  { %216 = vmatmul.f32.gmra.mxu1 %v178_v50 }
 0x138   :  { %v214_v2 = vpop.f32.mrf.mxu1 }
 0x139   :  { %v710_v3 = vadd.f32 %v425_v63, %v214_v2 }
 0x13b   :  { %v398_v5 = vclamps-f32 %v710_v3, 27.6041 }
 0x13d   :  { %275 = vmatmul.f32.vlgmr.msra.gmra.mxu2 %v398_v5 }
 0x140   :  { %v217_v7 = vpop.f32.mrf.mxu1 }
 0x141   :  { %v715_v8 = vadd.f32 %v425_v63, %v217_v7 }
 0x143   :  { %v399_v9 = vclamps-f32 %v715_v8, 27.6041 }
 0x145   :  { %278 = vmatmul.f32.gmra.mxu2 %v399_v9 }
 0x1c0   :  { %v276_v25 = vpop.f32.mrf.mxu2 }
 0x1c1   :  { %v277_v26 = vadd.f32 %v426_v22, %v276_v25 }
 0x1c3   :  { %v282_v28 = vmax.f32 %v277_v26, 0.0 }
 0x1c5   :  { %320 = vmatmul.f32.vlgmr.msra.gmra.mxu3 %v282_v28 }
 0x1c8   :  { %v279_v29 = vpop.f32.mrf.mxu2 }
 0x1c9   :  { %v280_v30 = vadd.f32 %v426_v22, %v279_v29 }
 0x1cb   :  { %v283_v31 = vmax.f32 %v280_v30, 0.0 }
 0x1cd   :  { %323 = vmatmul.f32.gmra.mxu3 %v283_v31 }
 0x248   :  { %v321_v37 = vpop.f32.mrf.mxu3 }
 0x249   :  { %v322_v38 = vadd.f32 %v427_v36, %v321_v37 }
 0x24b   :  { %v327_v39 = vadd.f32 %v398_v5, %v322_v38 }
 0x24d   :  { %v329_v40 = vmax.f32 %v327_v39, 0.0 }
 0x24f   :  { %367 = vmatmul.f32.vlgmr.msrb.gmra.mxu0 %v329_v40 }
 0x250   :  { %v324_v41 = vpop.f32.mrf.mxu3 }
 0x251   :  { %v325_v42 = vadd.f32 %v427_v36, %v324_v41 }
 0x253   :  { %v328_v43 = vadd.f32 %v399_v9, %v325_v42 }
 0x255   :  { %v330_v44 = vmax.f32 %v328_v43, 0.0 }
 0x257   :  { %370 = vmatmul.f32.vlgmr.msrb.gmra.mxu1 %v330_v44 }
 0x2cc   :  { %v368_v46 = vpop.f32.mrf.mxu0 }
 0x2cd   :  { %v369_v47 = vadd.f32 %v428_v45, %v368_v46 }
 0x2cf   :  { %374 = vst [vmem:[#allocation14] sm:$0xff] %v369_v47 }
 0x2d4   :  { %v371_v48 = vpop.f32.mrf.mxu1 }
 0x2d5   :  { %v372_v49 = vadd.f32 %v428_v45, %v371_v48 }
 0x2d7   :  { %375 = vst [vmem:[#allocation14 + $0x8] sm:$0xff] %v372_v49 }
 0x2d8   :  { %388 = dma.vmem_to_hbm [thread:$0]  %s381_s1, 256, %s383_s28, [#allocation5], %s608_s21, %s608_s21, %s609_s22  }
 0x2d9   :  { %605 = dma.done.wait [#allocation5], 256  }
 0x2da   :  { %606 = vsyncadd [#allocation5], 4294967040 }
 0x2db   :  { %393 = vsyncpa [#allocation4], 1 }
 0x2dc   :  { %394 = vsyncpa [#allocation7], 1 }
 0x2dd   :  { %395 = vsyncpa [#allocation10], 1 }
 0x2de   :  { %396 = vsyncpa [#allocation13], 1 }
 0x2df   :  { %397 = vsyncpa [#allocation5], 1 }

</bundles_post_ra>
